<compile_context>
chip_gen: v5e
topology: v5e:2x2
jax: 0.10.0
libtpu: 0.0.40
codegen_flags: <defaults>
</compile_context>

<pallas_src>
import functools

import jax
import jax.numpy as jnp
from jax import lax
from jax.experimental import pallas as pl
from jax.experimental.pallas import tpu as pltpu

LANES = 128
CHUNK_ROWS = 64            # 64x128 f32 = 8 vregs per operand per chunk
GRANULE = 8 * LANES        # kernel consumes whole (8,128)-element row groups
MAX_TILE_ROWS = 8192       # 4 MiB/input/buffer: safe on v7x (64 MiB phys VMEM)


def _round_up(v, m):
    return ((v + m - 1) // m) * m


def _mask_cond(z):
    # (z == 1) works for float/int masks; bool masks are already the condition.
    return z if z.dtype == jnp.bool_ else (z == 1)


def _choose_tile_rows(rows: int, requested: int) -> int:
    """Pick the per-grid-step row-tile size."""
    if rows < CHUNK_ROWS:
        # Tiny input: one full-extent tile (rows is a multiple of 8 by
        # construction, and block == full dim is always a legal tiling).
        return rows
    req = max(CHUNK_ROWS, (int(requested) // CHUNK_ROWS) * CHUNK_ROWS)
    req = min(req, MAX_TILE_ROWS)
    # Keep >= 4 tiles on big inputs (two v7x TensorCores x >=2 tiles each),
    # but never shrink below 256 rows so per-step DMA >> fixed step overhead.
    cap = max(256, _round_up(pl.cdiv(rows, 4), CHUNK_ROWS))
    return min(req, cap, (rows // CHUNK_ROWS) * CHUNK_ROWS)


def _masked_mse_kernel(x_ref, y_ref, z_ref, out_ref, *, total_rows, tile_rows,
                       chunk_rows, ragged):
    """Per-tile partial sums of ((z==1)*(x-y))**2 reduced to one (8,128) block."""
    tile_row0 = pl.program_id(0) * tile_rows

    def chunk_partial(row0):
        # Cast in-kernel (keeps HBM traffic at native dtype width).
        xs = x_ref[pl.ds(row0, chunk_rows), :].astype(jnp.float32)
        ys = y_ref[pl.ds(row0, chunk_rows), :].astype(jnp.float32)
        zs = z_ref[pl.ds(row0, chunk_rows), :]
        d = xs - ys
        sq = jnp.where(_mask_cond(zs), d * d, jnp.float32(0.0))
        if ragged:
            # Scrub rows past the end of the array (the final partial block's
            # DMA leaves garbage there, possibly NaN). This is a select and it
            # comes AFTER the z-select, so NaNs cannot propagate.
            rid = lax.broadcasted_iota(jnp.int32, sq.shape, 0)
            valid = (tile_row0 + row0 + rid) < total_rows
            sq = jnp.where(valid, sq, jnp.float32(0.0))
        # (chunk, 128) -> (chunk//8, 8, 128) -> (8, 128): elementwise adds
        # across vregs (VPU only, no cross-lane XLU work).
        return sq.reshape(chunk_rows // 8, 8, LANES).sum(axis=0)

    n_chunks = tile_rows // chunk_rows
    if n_chunks == 1:
        acc = chunk_partial(0)
    else:
        # Chunked accumulation bounds the live vreg set (~3 x 8 load vregs +
        # 1 accumulator) regardless of tile size -> no vreg spills.
        def body(c, acc):
            row0 = pl.multiple_of(c * chunk_rows, chunk_rows)
            return acc + chunk_partial(row0)

        acc = lax.fori_loop(0, n_chunks, body,
                            jnp.zeros((8, LANES), jnp.float32))

    out_ref[...] = acc.reshape(1, 8, LANES)


def my_loss(x, y, z, *, tile_rows=4096):
    """mean(((z == 1) * (x - y)) ** 2), computed with a Pallas TPU kernel."""
    n_elems = x.size

    xf = jnp.ravel(x)
    yf = jnp.ravel(y)
    zf = jnp.ravel(z)

    main = (n_elems // GRANULE) * GRANULE   # elements handled by the kernel
    rows = main // LANES                    # always a multiple of 8

    total = jnp.float32(0.0)

    if rows > 0:
        tile = _choose_tile_rows(rows, tile_rows)
        chunk = min(CHUNK_ROWS, tile)
        num_tiles = pl.cdiv(rows, tile)
        ragged = (num_tiles * tile != rows)

        if main == n_elems:
            x2, y2, z2 = xf, yf, zf          # free reshape, no copy
        else:
            # Prefix slices: correct, but XLA may materialise copies for a
            # custom-call operand when n % 1024 != 0 (perf-only concern).
            x2, y2, z2 = xf[:main], yf[:main], zf[:main]
        x2 = x2.reshape(rows, LANES)
        y2 = y2.reshape(rows, LANES)
        z2 = z2.reshape(rows, LANES)

        in_spec = pl.BlockSpec((tile, LANES), lambda i: (i, 0))
        out_bytes = num_tiles * 8 * LANES * 4
        bytes_accessed = (x2.size * x2.dtype.itemsize
                          + y2.size * y2.dtype.itemsize
                          + z2.size * z2.dtype.itemsize
                          + out_bytes)

        partials = pl.pallas_call(
            functools.partial(
                _masked_mse_kernel,
                total_rows=rows,
                tile_rows=tile,
                chunk_rows=chunk,
                ragged=ragged,
            ),
            out_shape=jax.ShapeDtypeStruct((num_tiles, 8, LANES), jnp.float32),
            grid_spec=pltpu.PrefetchScalarGridSpec(
                num_scalar_prefetch=0,
                grid=(num_tiles,),
                in_specs=[in_spec, in_spec, in_spec],
                out_specs=pl.BlockSpec((1, 8, LANES), lambda i: (i, 0, 0)),
            ),
            compiler_params=pltpu.CompilerParams(
                dimension_semantics=("parallel",),
                vmem_limit_bytes=32 * 1024 * 1024,
            ),
            cost_estimate=pl.CostEstimate(
                flops=5 * int(main),
                transcendentals=0,
                bytes_accessed=int(bytes_accessed),
            ),
        )(x2, y2, z2)

        total = total + jnp.sum(partials)

    # Tiny tail (< 1024 elements), handled exactly in plain jnp.
    if main < n_elems:
        xt = xf[main:].astype(jnp.float32)
        yt = yf[main:].astype(jnp.float32)
        zt = zf[main:]
        dt = xt - yt
        total = total + jnp.sum(
            jnp.where(_mask_cond(zt), dt * dt, jnp.float32(0.0)))

    return total / jnp.float32(n_elems)


if __name__ == "__main__":
    key = jax.random.PRNGKey(0)
    kx, ky, kz = jax.random.split(key, 3)

    def reference(x, y, z):
        xf = x.astype(jnp.float32)
        yf = y.astype(jnp.float32)
        return jnp.mean(((z == 1).astype(jnp.float32) * (xf - yf)) ** 2)

    # Case 1: segmentation-style NCHW input, size a multiple of 1024
    # (pure kernel path, single tile).
    shape = (2, 4, 32, 32)
    x = jax.random.normal(kx, shape, dtype=jnp.float32)
    y = jax.random.normal(ky, shape, dtype=jnp.float32)
    z = jax.random.bernoulli(kz, p=0.5, shape=shape).astype(jnp.float32)
    out = jax.block_until_ready(my_loss(x, y, z))
    ref = reference(x, y, z)
    assert jnp.allclose(out, ref, rtol=1e-5, atol=1e-7), (out, ref)

    # Case 2: ragged size (multi-tile kernel with in-kernel row mask + jnp tail).
    shape2 = (2, 5, 35, 37)   # 12950 elements
    x2 = jax.random.normal(kx, shape2, dtype=jnp.float32)
    y2 = jax.random.normal(ky, shape2, dtype=jnp.float32)
    z2 = jax.random.bernoulli(kz, p=0.5, shape=shape2).astype(jnp.float32)
    out2 = jax.block_until_ready(my_loss(x2, y2, z2))
    ref2 = reference(x2, y2, z2)
    assert jnp.allclose(out2, ref2, rtol=1e-5, atol=1e-7), (out2, ref2)

    print("KERNEL_OK")
</pallas_src>

<mosaic_0001>
module attributes {stable_mosaic.version = 11 : i64} {
  func.func @_masked_mse_kernel(%arg0: i32, %arg1: memref<64x128xf32, #tpu.memory_space<vmem>>, %arg2: memref<64x128xf32, #tpu.memory_space<vmem>>, %arg3: memref<64x128xf32, #tpu.memory_space<vmem>>, %arg4: memref<1x8x128xf32, #tpu.memory_space<vmem>>) attributes {dimension_semantics = [#tpu.dimension_semantics<parallel>], iteration_bounds = array<i64: 1>, scalar_prefetch = 0 : i64, scratch_operands = 0 : i64, tpu.core_type = #tpu.core_type<tc>, window_params = [{transform_indices = @transform_0, window_bounds = array<i64: 64, 128>}, {transform_indices = @transform_1, window_bounds = array<i64: 64, 128>}, {transform_indices = @transform_2, window_bounds = array<i64: 64, 128>}, {transform_indices = @transform_3, window_bounds = array<i64: 1, 8, 128>}]} {
    %c0 = arith.constant 0 : index
    %c0_0 = arith.constant 0 : index
    %0 = vector.load %arg1[%c0, %c0_0] : memref<64x128xf32, #tpu.memory_space<vmem>>, vector<64x128xf32>
    %c0_1 = arith.constant 0 : index
    %c0_2 = arith.constant 0 : index
    %1 = vector.load %arg2[%c0_1, %c0_2] : memref<64x128xf32, #tpu.memory_space<vmem>>, vector<64x128xf32>
    %c0_3 = arith.constant 0 : index
    %c0_4 = arith.constant 0 : index
    %2 = vector.load %arg3[%c0_3, %c0_4] : memref<64x128xf32, #tpu.memory_space<vmem>>, vector<64x128xf32>
    %3 = arith.subf %0, %1 : vector<64x128xf32>
    %cst = arith.constant 1.000000e+00 : f32
    %4 = vector.broadcast %cst : f32 to vector<64x128xf32>
    %5 = arith.cmpf oeq, %2, %4 : vector<64x128xf32>
    %6 = arith.mulf %3, %3 : vector<64x128xf32>
    %cst_5 = arith.constant 0.000000e+00 : f32
    %7 = vector.broadcast %cst_5 : f32 to vector<64x128xf32>
    %8 = arith.select %5, %6, %7 : vector<64x128xi1>, vector<64x128xf32>
    %9 = vector.shape_cast %8 : vector<64x128xf32> to vector<8x8x128xf32>
    %cst_6 = arith.constant dense<0.000000e+00> : vector<8x128xf32>
    %10 = vector.multi_reduction <add>, %9, %cst_6 [0] : vector<8x8x128xf32> to vector<8x128xf32>
    %11 = vector.shape_cast %10 : vector<8x128xf32> to vector<1x8x128xf32>
    %c0_7 = arith.constant 0 : index
    %c0_8 = arith.constant 0 : index
    %c0_9 = arith.constant 0 : index
    %12 = vector.load %arg4[%c0_7, %c0_8, %c0_9] : memref<1x8x128xf32, #tpu.memory_space<vmem>>, vector<1x8x128xf32>
    tpu.vector_store %arg4[%c0_7, %c0_8, %c0_9], %11 {strides = array<i32>} : memref<1x8x128xf32, #tpu.memory_space<vmem>>, vector<1x8x128xf32>,
    return
  }
  func.func @transform_0(%arg0: i32) -> (i32, i32) {
    %c0_i32 = arith.constant 0 : i32
    %c0_i32_0 = arith.constant 0 : i32
    return %arg0, %c0_i32 : i32, i32
  }
  func.func @transform_1(%arg0: i32) -> (i32, i32) {
    %c0_i32 = arith.constant 0 : i32
    %c0_i32_0 = arith.constant 0 : i32
    return %arg0, %c0_i32 : i32, i32
  }
  func.func @transform_2(%arg0: i32) -> (i32, i32) {
    %c0_i32 = arith.constant 0 : i32
    %c0_i32_0 = arith.constant 0 : i32
    return %arg0, %c0_i32 : i32, i32
  }
  func.func @transform_3(%arg0: i32) -> (i32, i32, i32) {
    %c0_i32 = arith.constant 0 : i32
    %c0_i32_0 = arith.constant 0 : i32
    %c0_i32_1 = arith.constant 0 : i32
    return %arg0, %c0_i32, %c0_i32_0 : i32, i32, i32
  }
}

</mosaic_0001>

<bundles_post_ra>
// kernel: tpu_custom_call.1
= control target key start
LH: loop header
LB: loop body
LE: loop exit
PB: predicated region body
PF: predicated region fallthrough
CT: control target
= control target key end

     0   :  { %8 = vsyncpa [#allocation3], 0  ;;  %s290_s0 = inlined_call_operand.hbm [shape: f32[64,128], index: 0, kind: input, shape index: {}]   ;;  %s291_s1 = inlined_call_operand.hbm [shape: f32[64,128], index: 1, kind: input, shape index: {}]   ;;  %s292_s2 = inlined_call_operand.hbm [shape: f32[64,128], index: 2, kind: input, shape index: {}]   ;;  %s293_s3 = inlined_call_operand.hbm [shape: f32[1,8,128], index: 3, kind: output, shape index: {}]  }
   0x1   :  { %9 = vsyncpa [#allocation6], 0 }
   0x2   :  { %10 = vsyncpa [#allocation4], 0  ;;  %s28_s14 = sshll.u32 %s291_s1, 4  ;;  %s252_s15 = smov [#allocation5]   ;;  %s29_s14 = int_to_ptr.hbm [resolvable:$true] %s28_s14 }
   0x3   :  { %s30_s16 = sshll.u32 %s252_s15, 4  ;;  %s15_s19 = sshll.u32 %s290_s0, 4  ;;  %s31_s16 = int_to_ptr.vmem [resolvable:$true] %s30_s16  ;;  %s16_s19 = int_to_ptr.hbm [resolvable:$true] %s15_s19 }
   0x4   :  { %s253_s20 = smov 128   ;;  %s254_s21 = smov 8  }
   0x5   :  { %36 = dma.hbm_to_vmem [thread:$0]  %s29_s14, 1024, %s31_s16, [#allocation6], %s253_s20, %s253_s20, %s254_s21  }
   0x6   :  { %s255_s22 = smov [#allocation2]   ;;  %s41_s26 = sshll.u32 %s292_s2, 4  ;;  %s42_s26 = int_to_ptr.hbm [resolvable:$true] %s41_s26 }
   0x7   :  { %s17_s23 = sshll.u32 %s255_s22, 4  ;;  %s256_s1 = smov [#allocation7]   ;;  %s18_s23 = int_to_ptr.vmem [resolvable:$true] %s17_s23 }
   0x8   :  { %23 = dma.hbm_to_vmem [thread:$0]  %s16_s19, 1024, %s18_s23, [#allocation3], %s253_s20, %s253_s20, %s254_s21  }
   0x9   :  { %s43_s27 = sshll.u32 %s256_s1, 4  ;;  %s44_s27 = int_to_ptr.vmem [resolvable:$true] %s43_s27 }
   0xa   :  { %49 = dma.hbm_to_vmem [thread:$0]  %s42_s26, 1024, %s44_s27, [#allocation6], %s253_s20, %s253_s20, %s254_s21  }
   0xb   :  { %246 = dma.done.wait [#allocation3], 1024  }
   0xc   :  { %247 = vsyncadd [#allocation3], 4294966272 }
   0xd   :  { %248 = dma.done.wait [#allocation6], 2048  }
   0xe   :  { %249 = vsyncadd [#allocation6], 4294965248  ;;  %v62_v0 = vld [vmem:[#allocation2] sm:$0xff]  ;;  %v63_v1 = vld [vmem:[#allocation2 + $0x8] sm:$0xff]  ;;  %s257_s0 = smov [#allocation8]   ;;  %s133_s30 = sshll.u32 %s293_s3, 4  ;;  %s134_s30 = int_to_ptr.hbm [resolvable:$true] %s133_s30 }
   0xf   :  { %v64_v2 = vld [vmem:[#allocation2 + $0x10] sm:$0xff]  ;;  %v65_v3 = vld [vmem:[#allocation2 + $0x18] sm:$0xff]  ;;  %v70_v4 = vld [vmem:[#allocation5] sm:$0xff]  ;;  %s131_s2 = sshll.u32 %s257_s0, 4  ;;  %s132_s2 = int_to_ptr.vmem [resolvable:$true] %s131_s2 }
  0x10   :  { %v71_v5 = vld [vmem:[#allocation5 + $0x8] sm:$0xff]  ;;  %v72_v6 = vld [vmem:[#allocation5 + $0x10] sm:$0xff]  ;;  %v73_v7 = vld [vmem:[#allocation5 + $0x18] sm:$0xff]  ;;  %v86_v8 = vsub.f32 %v62_v0, %v70_v4 }
  0x11   :  { %v66_v9 = vld [vmem:[#allocation2 + $0x20] sm:$0xff]  ;;  %v87_v11 = vsub.f32 %v63_v1, %v71_v5  ;;  %v88_v12 = vsub.f32 %v64_v2, %v72_v6  ;;  %v79_v14 = vld [vmem:[#allocation7 + $0x8] sm:$0xff]  ;;  %v89_v15 = vsub.f32 %v65_v3, %v73_v7  ;;  %v80_v18 = vld [vmem:[#allocation7 + $0x10] sm:$0xff] }
  0x12   :  { %v74_v10 = vld [vmem:[#allocation5 + $0x20] sm:$0xff]  ;;  %v67_v16 = vld [vmem:[#allocation2 + $0x28] sm:$0xff]  ;;  %v102_v19 = vmul.f32 %v86_v8, %v86_v8  ;;  %v81_v21 = vld [vmem:[#allocation7 + $0x18] sm:$0xff]  ;;  %vm95_vm1 = vcmp.eq.f32.partialorder %v79_v14, 1.0  ;;  %vm96_vm2 = vcmp.eq.f32.partialorder %v80_v18, 1.0 }
  0x13   :  { %v78_v13 = vld [vmem:[#allocation7] sm:$0xff]  ;;  %v75_v17 = vld [vmem:[#allocation5 + $0x28] sm:$0xff]  ;;  %v103_v20 = vmul.f32 %v87_v11, %v87_v11  ;;  %v90_v22 = vsub.f32 %v66_v9, %v74_v10  ;;  %v104_v23 = vmul.f32 %v88_v12, %v88_v12  ;;  %v68_v24 = vld [vmem:[#allocation2 + $0x30] sm:$0xff]  ;;  %v105_v28 = vmul.f32 %v89_v15, %v89_v15 }
  0x14   :  { %vm94_vm0 = vcmp.eq.f32.partialorder %v78_v13, 1.0  ;;  %v76_v25 = vld [vmem:[#allocation5 + $0x30] sm:$0xff]  ;;  %v82_v26 = vld [vmem:[#allocation7 + $0x20] sm:$0xff]  ;;  %v91_v27 = vsub.f32 %v67_v16, %v75_v17  ;;  %v69_v29 = vld [vmem:[#allocation2 + $0x38] sm:$0xff]  ;;  %vm97_vm3 = vcmp.eq.f32.partialorder %v81_v21, 1.0 }
  0x15   :  { %v77_v30 = vld [vmem:[#allocation5 + $0x38] sm:$0xff]  ;;  %v110_v31 = vsel %vm94_vm0, %v102_v19, 0.0  ;;  %v111_v32 = vsel %vm95_vm1, %v103_v20, 0.0  ;;  %v83_v33 = vld [vmem:[#allocation7 + $0x28] sm:$0xff]  ;;  %v92_v34 = vsub.f32 %v68_v24, %v76_v25  ;;  %v106_v35 = vmul.f32 %v90_v22, %v90_v22  ;;  %v84_v38 = vld [vmem:[#allocation7 + $0x30] sm:$0xff] }
  0x16   :  { %v112_v36 = vsel %vm96_vm2, %v104_v23, 0.0  ;;  %vm98_vm4 = vcmp.eq.f32.partialorder %v82_v26, 1.0  ;;  %v118_v37 = vadd.f32 %v111_v32, %v110_v31  ;;  %v93_v39 = vsub.f32 %v69_v29, %v77_v30  ;;  %v85_v43 = vld [vmem:[#allocation7 + $0x38] sm:$0xff] }
  0x17   :  { %v107_v40 = vmul.f32 %v91_v27, %v91_v27  ;;  %v113_v41 = vsel %vm97_vm3, %v105_v28, 0.0  ;;  %vm99_vm5 = vcmp.eq.f32.partialorder %v83_v33, 1.0  ;;  %v108_v44 = vmul.f32 %v92_v34, %v92_v34 }
  0x18   :  { %v119_v42 = vadd.f32 %v118_v37, %v112_v36  ;;  %v114_v45 = vsel %vm98_vm4, %v106_v35, 0.0  ;;  %vm100_vm6 = vcmp.eq.f32.partialorder %v84_v38, 1.0  ;;  %v109_v47 = vmul.f32 %v93_v39, %v93_v39 }
  0x19   :  { %v115_v48 = vsel %vm99_vm5, %v107_v40, 0.0  ;;  %vm101_vm7 = vcmp.eq.f32.partialorder %v85_v43, 1.0  ;;  %v116_v50 = vsel %vm100_vm6, %v108_v44, 0.0 }
  0x1a   :  { %v120_v46 = vadd.f32 %v119_v42, %v113_v41  ;;  %v117_v52 = vsel %vm101_vm7, %v109_v47, 0.0 }
  0x1c   :  { %v121_v49 = vadd.f32 %v120_v46, %v114_v45 }
  0x1e   :  { %v122_v51 = vadd.f32 %v121_v49, %v115_v48 }
  0x20   :  { %v123_v53 = vadd.f32 %v122_v51, %v116_v50 }
  0x22   :  { %v124_v54 = vadd.f32 %v123_v53, %v117_v52 }
  0x24   :  { %125 = vst [vmem:[#allocation8] sm:$0xff] %v124_v54 }
  0x25   :  { %136 = dma.vmem_to_hbm [thread:$0]  %s132_s2, 128, %s134_s30, [#allocation4]  }
  0x26   :  { %250 = dma.done.wait [#allocation4], 128  }
  0x27   :  { %251 = vsyncadd [#allocation4], 4294967168 }
  0x28   :  { %141 = vsyncpa [#allocation3], 1 }
  0x29   :  { %142 = vsyncpa [#allocation6], 1 }
  0x2a   :  { %143 = vsyncpa [#allocation4], 1 }

</bundles_post_ra>
